<compile_context>
chip_gen: v6e
topology: v6e:2x2x1
jax: 0.10.0
libtpu: 0.0.40
codegen_flags: <defaults>
</compile_context>

<pallas_src>
import jax
import jax.numpy as jnp
from jax.experimental import pallas as pl
from jax.experimental.pallas import tpu as pltpu

_LANE = 128
_PAD_QUANTUM = 8 * _LANE


def _wlp_kernel(w_ref, *refs):
    """refs = (x_0, ..., x_{L-1}, out). Fused weighted sum over layers.

    w_ref holds the already-normalized layer weights (f32, SMEM), so the
    output is sum_l w_ref[l] * x_l, accumulated in f32 and cast once on the
    final store.
    """
    *x_refs, o_ref = refs
    acc = w_ref[0] * x_refs[0][...].astype(jnp.float32)
    for l in range(1, len(x_refs)):
        acc = acc + w_ref[l] * x_refs[l][...].astype(jnp.float32)
    o_ref[...] = acc.astype(o_ref.dtype)


def _lane_dense_layout(B, S, H):
    """Pick a 2D [R, C] view with a lane-dense trailing dim.

    Returns (R, C, pad_elems). C is always a multiple of 128; pad_elems > 0
    means each flattened layer must be zero-padded by that many elements
    (and the output sliced back).
    """
    total = B * S * H
    if H % _LANE == 0:
        return B * S, H, 0
    if total % _LANE == 0:
        return total // _LANE, _LANE, 0
    padded = pl.cdiv(total, _PAD_QUANTUM) * _PAD_QUANTUM
    return padded // _LANE, _LANE, padded - total


def _vmem_budget_and_limit():
    """Generation-aware (tile-footprint budget, vmem_limit_bytes)."""
    mib = 1024 * 1024
    phys_vmem = 128 * mib
    try:
        phys_vmem = int(pltpu.get_tpu_info().vmem_capacity_bytes)
    except Exception:
        pass  # fall back to 128 MiB-class assumptions
    if phys_vmem <= 64 * mib:
        # v7x-class: 64 MiB physical VMEM -> keep buffers well under half.
        return 24 * mib, 48 * mib
    # v5e / v6e: 128 MiB physical VMEM, ample headroom.
    return 24 * mib, 64 * mib


def weighted_layer_pooling(features, layer_start, layer_weights):
    """features: list of [B, S, H] arrays (num_hidden_layers + 1 of them).

    layer_weights: [num_hidden_layers + 1 - layer_start] float weights.
    Returns the weighted average over features[layer_start:], shape [B, S, H].
    """
    used = list(features[layer_start:])     # only the layers we actually read
    L = len(used)
    B, S, H = used[0].shape
    assert layer_weights.shape == (L,)

    dtype = used[0].dtype
    itemsize = jnp.dtype(dtype).itemsize

    # Pre-normalize weights on the host: removes the in-kernel divide pass.
    w = layer_weights.astype(jnp.float32)
    w_normed = w / jnp.sum(w)

    # Lane-dense 2D layout (pad the odd-shape case to stay on unmasked vst).
    R, C, pad = _lane_dense_layout(B, S, H)
    if pad:
        xs = [jnp.pad(f.reshape(-1), (0, pad)).reshape(R, C) for f in used]
    else:
        xs = [f.reshape(R, C) for f in used]

    budget_bytes, vmem_limit = _vmem_budget_and_limit()

    # Dtype-native sublane multiple: 8 for f32, 16 for bf16, 32 for int8/fp8.
    sub = max(8, 32 // itemsize)

    # Row-tile size from the VMEM budget: L inputs x 2 (double buffer)
    # + output x 2, all C lanes wide.
    bytes_per_row = C * itemsize * (2 * L + 2)
    tm = budget_bytes // max(bytes_per_row, 1)
    tm = max(sub, (tm // sub) * sub)

    # Keep >= 2 grid steps when the row count permits, so the "parallel"
    # axis actually shards across both v7x TensorCores.
    if R > sub:
        half_rows = (R + 1) // 2
        half_rows = ((half_rows + sub - 1) // sub) * sub
        tm = min(tm, max(half_rows, sub))
    if tm >= R:
        tm = R                               # full-extent block is always legal
    grid = (pl.cdiv(R, tm),)

    row_spec = lambda i: (i, 0)

    out2d = pl.pallas_call(
        _wlp_kernel,
        out_shape=jax.ShapeDtypeStruct((R, C), dtype),
        grid=grid,
        in_specs=(
            [pl.BlockSpec(memory_space=pltpu.MemorySpace.SMEM)]    # weights
            + [pl.BlockSpec((tm, C), row_spec) for _ in range(L)]  # layers
        ),
        out_specs=pl.BlockSpec((tm, C), row_spec),
        compiler_params=pltpu.CompilerParams(
            dimension_semantics=("parallel",),       # megacore shard on v7x
            vmem_limit_bytes=vmem_limit,
        ),
        cost_estimate=pl.CostEstimate(
            flops=2 * L * R * C,
            transcendentals=0,
            bytes_accessed=(L + 1) * R * C * itemsize,
        ),
    )(w_normed, *xs)

    if pad:
        return out2d.reshape(-1)[: B * S * H].reshape(B, S, H)
    return out2d.reshape(B, S, H)


def _reference(features, layer_start, layer_weights):
    x = jnp.stack([f.astype(jnp.float32) for f in features])[layer_start:]
    w = layer_weights.astype(jnp.float32)
    return jnp.sum(w[:, None, None, None] * x, axis=0) / jnp.sum(w)


if __name__ == "__main__":
    # Module config (matches WeightedLayerPooling.__init__)
    num_hidden_layers = 4
    layer_start = 2
    if layer_start < 0:
        layer_start = num_hidden_layers + 1 + layer_start
    # default nn.Parameter init: all ones, length = num_hidden_layers + 1 - layer_start
    layer_weights = jnp.ones((num_hidden_layers + 1 - layer_start,), jnp.float32)

    key = jax.random.PRNGKey(0)

    # Test 1: small spec shape (H=32 -> flat [B*S*H/128, 128] path, grid=1)
    B, S, H = 2, 8, 32
    keys = jax.random.split(key, num_hidden_layers + 1)
    features = [jax.random.normal(k, (B, S, H), jnp.float32) for k in keys]
    out = jax.block_until_ready(
        weighted_layer_pooling(features, layer_start, layer_weights))
    ref = _reference(features, layer_start, layer_weights)
    assert out.shape == (B, S, H)
    assert jnp.allclose(out, ref, atol=1e-5, rtol=1e-5)

    # Test 2: H multiple of 128 (row-tiled path, grid split >= 2 steps)
    B2, S2, H2 = 2, 16, 128
    keys2 = jax.random.split(jax.random.PRNGKey(1), num_hidden_layers + 1)
    features2 = [jax.random.normal(k, (B2, S2, H2), jnp.float32) for k in keys2]
    out2 = jax.block_until_ready(
        weighted_layer_pooling(features2, layer_start, layer_weights))
    ref2 = _reference(features2, layer_start, layer_weights)
    assert out2.shape == (B2, S2, H2)
    assert jnp.allclose(out2, ref2, atol=1e-5, rtol=1e-5)

    # Test 3: odd H (neither H nor B*S*H divisible by 128 -> padded path)
    B3, S3, H3 = 2, 8, 33
    keys3 = jax.random.split(jax.random.PRNGKey(2), num_hidden_layers + 1)
    features3 = [jax.random.normal(k, (B3, S3, H3), jnp.float32) for k in keys3]
    out3 = jax.block_until_ready(
        weighted_layer_pooling(features3, layer_start, layer_weights))
    ref3 = _reference(features3, layer_start, layer_weights)
    assert out3.shape == (B3, S3, H3)
    assert jnp.allclose(out3, ref3, atol=1e-5, rtol=1e-5)

    # Test 4: bf16 activations (dtype-native sublane rounding = 16)
    B4, S4, H4 = 2, 16, 128
    keys4 = jax.random.split(jax.random.PRNGKey(3), num_hidden_layers + 1)
    features4 = [jax.random.normal(k, (B4, S4, H4), jnp.float32).astype(jnp.bfloat16)
                 for k in keys4]
    out4 = jax.block_until_ready(
        weighted_layer_pooling(features4, layer_start, layer_weights))
    ref4 = _reference(features4, layer_start, layer_weights)
    assert out4.shape == (B4, S4, H4)
    assert jnp.allclose(out4.astype(jnp.float32), ref4, atol=2e-2, rtol=2e-2)

    print("KERNEL_OK")
</pallas_src>

<mosaic_0001>
module attributes {stable_mosaic.version = 11 : i64} {
  func.func @_wlp_kernel(%arg0: i32, %arg1: memref<3xf32, #tpu.memory_space<smem>>, %arg2: memref<4x128xf32, #tpu.memory_space<vmem>>, %arg3: memref<4x128xf32, #tpu.memory_space<vmem>>, %arg4: memref<4x128xf32, #tpu.memory_space<vmem>>, %arg5: memref<4x128xf32, #tpu.memory_space<vmem>>) attributes {dimension_semantics = [#tpu.dimension_semantics<parallel>], iteration_bounds = array<i64: 1>, scalar_prefetch = 0 : i64, scratch_operands = 0 : i64, tpu.core_type = #tpu.core_type<tc>, window_params = [{transform_indices = @transform_0, window_bounds = array<i64: 3>}, {transform_indices = @transform_1, window_bounds = array<i64: 4, 128>}, {transform_indices = @transform_2, window_bounds = array<i64: 4, 128>}, {transform_indices = @transform_3, window_bounds = array<i64: 4, 128>}, {transform_indices = @transform_4, window_bounds = array<i64: 4, 128>}]} {
    %c0 = arith.constant 0 : index
    %0 = memref.load %arg1[%c0] : memref<3xf32, #tpu.memory_space<smem>>
    %c0_0 = arith.constant 0 : index
    %c0_1 = arith.constant 0 : index
    %1 = vector.load %arg2[%c0_0, %c0_1] : memref<4x128xf32, #tpu.memory_space<vmem>>, vector<4x128xf32>
    %2 = vector.broadcast %0 : f32 to vector<4x128xf32>
    %3 = arith.mulf %2, %1 : vector<4x128xf32>
    %c1 = arith.constant 1 : index
    %4 = memref.load %arg1[%c1] : memref<3xf32, #tpu.memory_space<smem>>
    %c0_2 = arith.constant 0 : index
    %c0_3 = arith.constant 0 : index
    %5 = vector.load %arg3[%c0_2, %c0_3] : memref<4x128xf32, #tpu.memory_space<vmem>>, vector<4x128xf32>
    %6 = vector.broadcast %4 : f32 to vector<4x128xf32>
    %7 = arith.mulf %6, %5 : vector<4x128xf32>
    %8 = arith.addf %3, %7 : vector<4x128xf32>
    %c2 = arith.constant 2 : index
    %9 = memref.load %arg1[%c2] : memref<3xf32, #tpu.memory_space<smem>>
    %c0_4 = arith.constant 0 : index
    %c0_5 = arith.constant 0 : index
    %10 = vector.load %arg4[%c0_4, %c0_5] : memref<4x128xf32, #tpu.memory_space<vmem>>, vector<4x128xf32>
    %11 = vector.broadcast %9 : f32 to vector<4x128xf32>
    %12 = arith.mulf %11, %10 : vector<4x128xf32>
    %13 = arith.addf %8, %12 : vector<4x128xf32>
    %c0_6 = arith.constant 0 : index
    %c0_7 = arith.constant 0 : index
    %14 = vector.load %arg5[%c0_6, %c0_7] : memref<4x128xf32, #tpu.memory_space<vmem>>, vector<4x128xf32>
    tpu.vector_store %arg5[%c0_6, %c0_7], %13 {strides = array<i32>} : memref<4x128xf32, #tpu.memory_space<vmem>>, vector<4x128xf32>,
    return
  }
  func.func @transform_0(%arg0: i32) -> i32 {
    %c0_i32 = arith.constant 0 : i32
    %c0_i32_0 = arith.constant 0 : i32
    return %c0_i32 : i32
  }
  func.func @transform_1(%arg0: i32) -> (i32, i32) {
    %c0_i32 = arith.constant 0 : i32
    %c0_i32_0 = arith.constant 0 : i32
    return %arg0, %c0_i32 : i32, i32
  }
  func.func @transform_2(%arg0: i32) -> (i32, i32) {
    %c0_i32 = arith.constant 0 : i32
    %c0_i32_0 = arith.constant 0 : i32
    return %arg0, %c0_i32 : i32, i32
  }
  func.func @transform_3(%arg0: i32) -> (i32, i32) {
    %c0_i32 = arith.constant 0 : i32
    %c0_i32_0 = arith.constant 0 : i32
    return %arg0, %c0_i32 : i32, i32
  }
  func.func @transform_4(%arg0: i32) -> (i32, i32) {
    %c0_i32 = arith.constant 0 : i32
    %c0_i32_0 = arith.constant 0 : i32
    return %arg0, %c0_i32 : i32, i32
  }
}

</mosaic_0001>

<bundles_post_ra>
// kernel: tpu_custom_call.1
= control target key start
LH: loop header
LB: loop body
LE: loop exit
PB: predicated region body
PF: predicated region fallthrough
CT: control target
= control target key end

     0   :  { %9 = vsyncpa [#allocation5], 0  ;;  %s211_s0 = inlined_call_operand.hbm [shape: f32[3], index: 0, kind: input, shape index: {}]   ;;  %s212_s1 = inlined_call_operand.hbm [shape: f32[4,128], index: 1, kind: input, shape index: {}]   ;;  %s213_s2 = inlined_call_operand.hbm [shape: f32[4,128], index: 2, kind: input, shape index: {}]   ;;  %s214_s3 = inlined_call_operand.vmem [shape: f32[4,128], index: 3, kind: input, shape index: {}]   ;;  %s215_s4 = inlined_call_operand.hbm [shape: f32[4,128], index: 4, kind: output, shape index: {}]  }
   0x1   :  { %10 = vsyncpa [#allocation3], 0 }
   0x2   :  { %11 = vsyncpa [#allocation8], 0 }
   0x3   :  { %12 = vsyncpa [#allocation4], 0  ;;  %s167_s15 = smov [#allocation2]   ;;  %s168_s18 = smov [#allocation6]  }
   0x4   :  { %20 = dma.hbm_to_smem %s211_s0, 16, %s167_s15, [#allocation5]  }
   0x5   :  { %s27_s19 = sshll.u32 %s168_s18, 4  ;;  %s169_s20 = smov [#allocation7]   ;;  %s28_s19 = int_to_ptr.vmem [resolvable:$true] %s27_s19 }
   0x6   :  { %s37_s21 = sshll.u32 %s169_s20, 4  ;;  %s107_s22 = scalar_lea.vmem %s28_s19, 64  ;;  %s38_s21 = int_to_ptr.vmem [resolvable:$true] %s37_s21 }
   0x7   :  { %p108_p0 = scmp.ne.s32.totalorder %s28_s19, %s107_s22  ;;  %p112_p1 = scmp.lt.s32.totalorder %s28_s19, %s28_s19 }
   0x8   :  { %p113_p2 = scmp.lt.s32.totalorder %s107_s22, %s107_s22 }
   0xa   :  { %p114_p3 = por %p113_p2, %p112_p1 }
   0xc   :  { %p115_p4 = pnand %p114_p3, %p108_p0 }
   0xe   :  { %118 = shalt.err (!%p115_p4)
}
   0xf   :  { %30 = dma.hbm_to_vmem [thread:$0]  %s212_s1, 64, %s28_s19, [#allocation3]  }
  0x10   :  { %s127_s25 = scalar_lea.vmem %s38_s21, 64  ;;  %p132_p6 = scmp.lt.s32.totalorder %s38_s21, %s38_s21 }
  0x11   :  { %p128_p5 = scmp.ne.s32.totalorder %s38_s21, %s127_s25  ;;  %p133_p7 = scmp.lt.s32.totalorder %s127_s25, %s127_s25 }
  0x13   :  { %p134_p8 = por %p133_p7, %p132_p6 }
  0x15   :  { %p135_p9 = pnand %p134_p8, %p128_p5 }
  0x17   :  { %138 = shalt.err (!%p135_p9)
}
  0x18   :  { %40 = dma.hbm_to_vmem [thread:$0]  %s213_s2, 64, %s38_s21, [#allocation8]  }
  0x19   :  { %159 = dma.done.wait [#allocation5], 16  }
  0x1a   :  { %160 = vsyncadd [#allocation5], 4294967280 }
  0x1b   :  { %161 = dma.done.wait [#allocation3], 64  }
  0x1c   :  { %162 = vsyncadd [#allocation3], 4294967232 }
  0x1d   :  { %163 = dma.done.wait [#allocation8], 64  }
  0x1e   :  { %164 = vsyncadd [#allocation8], 4294967232 }
  0x1f   :  { %52 = sfence }
  0x20   :  { %s53_s1 = sld [smem:[#allocation2]]  ;;  %v54_v0 = vld [vmem:[#allocation6] sm:$0xf]  ;;  %v58_v1 = vld [vmem:[#allocation7] sm:$0xf]  ;;  %s170_s2 = smov [#allocation9]  }
  0x21   :  { %s85_s27 = sld [smem:[#allocation2 + $0x1]]  ;;  %v63_v3 = vld [vmem:[%s214_s3] sm:$0xf]  ;;  %s74_s5 = sshll.u32 %s170_s2, 4  ;;  %s75_s5 = int_to_ptr.vmem [resolvable:$true] %s74_s5 }
  0x22   :  { %s86_s28 = sld [smem:[#allocation2 + $0x2]]  ;;  %s139_s6 = scalar_lea.vmem %s75_s5, 64 }
  0x23   :  { %p140_p10 = scmp.ne.s32.totalorder %s75_s5, %s139_s6  ;;  %p144_p11 = scmp.lt.s32.totalorder %s75_s5, %s75_s5 }
  0x24   :  { %p145_p12 = scmp.lt.s32.totalorder %s139_s6, %s139_s6 }
  0x26   :  { %v55_v2 = vstv %s53_s1  ;;  %p146_p13 = por %p145_p12, %p144_p11 }
  0x27   :  { %v56_v4 = vmul.f32 %v55_v2, %v54_v0  ;;  %v59_v5 = vstv %s85_s27 }
  0x28   :  { %v60_v6 = vmul.f32 %v59_v5, %v58_v1  ;;  %v64_v7 = vstv %s86_s28  ;;  %p147_p0 = pnand %p146_p13, %p140_p10 }
  0x29   :  { %v65_v8 = vmul.f32 %v64_v7, %v63_v3 }
  0x2a   :  { %v61_v9 = vadd.f32 %v60_v6, %v56_v4 }
  0x2c   :  { %v66_v10 = vadd.f32 %v65_v8, %v61_v9 }
  0x2e   :  { %67 = vst [vmem:[#allocation9] sm:$0xf] %v66_v10 }
  0x2f   :  { %150 = shalt.err (!%p147_p0)
}
  0x30   :  { %77 = dma.vmem_to_hbm [thread:$0]  %s75_s5, 64, %s215_s4, [#allocation4]  }
  0x31   :  { %165 = dma.done.wait [#allocation4], 64  }
  0x32   :  { %166 = vsyncadd [#allocation4], 4294967232 }
  0x33   :  { %81 = vsyncpa [#allocation3], 1 }
  0x34   :  { %82 = vsyncpa [#allocation8], 1 }
  0x35   :  { %83 = vsyncpa [#allocation4], 1 }
  0x36   :  { %84 = vsyncpa [#allocation5], 1 }

</bundles_post_ra>
